<compile_context>
chip_gen: v6e
topology: v6e:2x2x1
jax: 0.10.0
libtpu: 0.0.40
codegen_flags: <defaults>
</compile_context>

<pallas_src>
import jax
import jax.numpy as jnp
from jax.experimental import pallas as pl
from jax.experimental.pallas import tpu as pltpu

_LANES = 128
_TILE_ROWS = 4096          # 4096 * 128 * 4 B = 2 MiB per f32 block
_PAD_GRAN = 8 * _LANES     # minimal (sublane, lane) tile granularity


def _swish_kernel(x_ref, o_ref):
    x = x_ref[...]
    # Compute in f32 regardless of input dtype (bf16-safe, costs nothing while
    # memory-bound), cast back on the store.
    x32 = x.astype(jnp.float32)
    sig = 1.0 / (1.0 + jnp.exp(-x32))
    o_ref[...] = (x32 * sig).astype(o_ref.dtype)


def swish_pallas(x: jax.Array) -> jax.Array:
    orig_shape = x.shape
    orig_dtype = x.dtype

    flat = x.reshape(-1)
    n = flat.shape[0]

    # Pad only to the minimal (8, 128) tile granularity, and only if needed.
    n_pad = pl.cdiv(n, _PAD_GRAN) * _PAD_GRAN
    padded = n_pad != n
    if padded:
        flat = jnp.pad(flat, (0, n_pad - n))

    rows = n_pad // _LANES            # multiple of 8 by construction
    x2d = flat.reshape(rows, _LANES)

    # Block rows: big (2 MiB f32) but never larger than the array; always a
    # multiple of 8.  The last grid block may be ragged — Pallas masks it.
    block_rows = min(_TILE_ROWS, rows)
    grid = (pl.cdiv(rows, block_rows),)

    out2d = pl.pallas_call(
        _swish_kernel,
        out_shape=jax.ShapeDtypeStruct((rows, _LANES), orig_dtype),
        grid_spec=pltpu.PrefetchScalarGridSpec(
            num_scalar_prefetch=0,
            grid=grid,
            in_specs=[pl.BlockSpec((block_rows, _LANES), lambda i: (i, 0))],
            out_specs=pl.BlockSpec((block_rows, _LANES), lambda i: (i, 0)),
        ),
        compiler_params=pltpu.CompilerParams(
            dimension_semantics=("parallel",),
        ),
    )(x2d)

    out_flat = out2d.reshape(-1)
    if padded:
        out_flat = out_flat[:n]
    return out_flat.reshape(orig_shape)


def _swish_ref(x):
    return x * jax.nn.sigmoid(x)


if __name__ == "__main__":
    key = jax.random.PRNGKey(0)
    # Shape consistent with a typical (N, C, H, W) activation map.
    x = jax.random.normal(key, (2, 4, 16, 16), dtype=jnp.float32)

    out = swish_pallas(x)
    out = jax.block_until_ready(out)

    ref = _swish_ref(x)
    assert out.shape == x.shape and out.dtype == x.dtype
    assert jnp.allclose(out, ref, atol=1e-5, rtol=1e-5), "mismatch vs reference"

    # Also sanity-check a bf16 input (internal f32 math path).
    xb = jax.random.normal(jax.random.PRNGKey(1), (3, 5, 7), dtype=jnp.bfloat16)
    outb = jax.block_until_ready(swish_pallas(xb))
    refb = (xb.astype(jnp.float32) * jax.nn.sigmoid(xb.astype(jnp.float32))).astype(jnp.bfloat16)
    assert outb.shape == xb.shape and outb.dtype == xb.dtype
    assert jnp.allclose(outb.astype(jnp.float32), refb.astype(jnp.float32), atol=2e-2, rtol=2e-2)

    print("KERNEL_OK")
</pallas_src>

<mosaic_0001>
module attributes {stable_mosaic.version = 11 : i64} {
  func.func @_swish_kernel(%arg0: i32, %arg1: memref<16x128xf32, #tpu.memory_space<vmem>>, %arg2: memref<16x128xf32, #tpu.memory_space<vmem>>) attributes {dimension_semantics = [#tpu.dimension_semantics<parallel>], iteration_bounds = array<i64: 1>, scalar_prefetch = 0 : i64, scratch_operands = 0 : i64, tpu.core_type = #tpu.core_type<tc>, window_params = [{transform_indices = @transform_0, window_bounds = array<i64: 16, 128>}, {transform_indices = @transform_1, window_bounds = array<i64: 16, 128>}]} {
    %c0 = arith.constant 0 : index
    %c0_0 = arith.constant 0 : index
    %0 = vector.load %arg1[%c0, %c0_0] : memref<16x128xf32, #tpu.memory_space<vmem>>, vector<16x128xf32>
    %cst = arith.constant 0.000000e+00 : f32
    %1 = vector.broadcast %cst : f32 to vector<16x128xf32>
    %2 = arith.subf %1, %0 : vector<16x128xf32>
    %3 = math.exp %2 : vector<16x128xf32>
    %cst_1 = arith.constant 1.000000e+00 : f32
    %4 = vector.broadcast %cst_1 : f32 to vector<16x128xf32>
    %5 = arith.addf %4, %3 : vector<16x128xf32>
    %cst_2 = arith.constant 1.000000e+00 : f32
    %6 = vector.broadcast %cst_2 : f32 to vector<16x128xf32>
    %7 = arith.divf %6, %5 : vector<16x128xf32>
    %8 = arith.mulf %0, %7 : vector<16x128xf32>
    %c0_3 = arith.constant 0 : index
    %c0_4 = arith.constant 0 : index
    %9 = vector.load %arg2[%c0_3, %c0_4] : memref<16x128xf32, #tpu.memory_space<vmem>>, vector<16x128xf32>
    tpu.vector_store %arg2[%c0_3, %c0_4], %8 {strides = array<i32>} : memref<16x128xf32, #tpu.memory_space<vmem>>, vector<16x128xf32>,
    return
  }
  func.func @transform_0(%arg0: i32) -> (i32, i32) {
    %c0_i32 = arith.constant 0 : i32
    %c0_i32_0 = arith.constant 0 : i32
    return %arg0, %c0_i32 : i32, i32
  }
  func.func @transform_1(%arg0: i32) -> (i32, i32) {
    %c0_i32 = arith.constant 0 : i32
    %c0_i32_0 = arith.constant 0 : i32
    return %arg0, %c0_i32 : i32, i32
  }
}

</mosaic_0001>

<bundles_post_ra>
// kernel: tpu_custom_call.1
= control target key start
LH: loop header
LB: loop body
LE: loop exit
PB: predicated region body
PF: predicated region fallthrough
CT: control target
= control target key end

     0   :  { %6 = vsyncpa [#allocation3], 0  ;;  %s140_s0 = inlined_call_operand.hbm [shape: f32[16,128], index: 0, kind: input, shape index: {}]   ;;  %s141_s1 = inlined_call_operand.hbm [shape: f32[16,128], index: 1, kind: output, shape index: {}]  }
   0x1   :  { %7 = vsyncpa [#allocation4], 0  ;;  %s114_s6 = smov [#allocation2]  }
   0x2   :  { %s13_s7 = sshll.u32 %s114_s6, 4  ;;  %s14_s7 = int_to_ptr.vmem [resolvable:$true] %s13_s7 }
   0x3   :  { %s78_s8 = scalar_lea.vmem %s14_s7, 256  ;;  %p83_p1 = scmp.lt.s32.totalorder %s14_s7, %s14_s7 }
   0x4   :  { %p79_p0 = scmp.ne.s32.totalorder %s14_s7, %s78_s8  ;;  %p84_p2 = scmp.lt.s32.totalorder %s78_s8, %s78_s8 }
   0x6   :  { %p85_p3 = por %p84_p2, %p83_p1 }
   0x8   :  { %p86_p4 = pnand %p85_p3, %p79_p0 }
   0xa   :  { %89 = shalt.err (!%p86_p4)
}
   0xb   :  { %s115_s9 = smov 128   ;;  %s116_s10 = smov 8  }
   0xc   :  { %19 = dma.hbm_to_vmem [thread:$0]  %s140_s0, 256, %s14_s7, [#allocation3], %s115_s9, %s115_s9, %s116_s10  }
   0xd   :  { %110 = dma.done.wait [#allocation3], 256  }
   0xe   :  { %111 = vsyncadd [#allocation3], 4294967040  ;;  %v23_v0 = vld [vmem:[#allocation2] sm:$0xff]  ;;  %v24_v1 = vld [vmem:[#allocation2 + $0x8] sm:$0xff]  ;;  %s117_s13 = smov [#allocation5]  }
   0xf   :  { %v25_v2 = vsub.f32 0.0, %v23_v0  ;;  %v26_v3 = vsub.f32 0.0, %v24_v1  ;;  %s46_s14 = sshll.u32 %s117_s13, 4  ;;  %s47_s14 = int_to_ptr.vmem [resolvable:$true] %s46_s14 }
  0x10   :  { %s90_s0 = scalar_lea.vmem %s47_s14, 256  ;;  %p95_p6 = scmp.lt.s32.totalorder %s47_s14, %s47_s14 }
  0x11   :  { %v27_v4 = vmul.f32 1.442695, %v25_v2  ;;  %v29_v5 = vmul.f32 1.442695, %v26_v3  ;;  %p91_p5 = scmp.ne.s32.totalorder %s47_s14, %s90_s0  ;;  %p96_p7 = scmp.lt.s32.totalorder %s90_s0, %s90_s0 }
  0x13   :  { %62 = vpow2.f32 %v27_v4  ;;  %p97_p8 = por %p96_p7, %p95_p6 }
  0x14   :  { %64 = vpow2.f32 %v29_v5 }
  0x15   :  { %p98_p9 = pnand %p97_p8, %p91_p5 }
  0x20   :  { %v63_v6 = vpop.eup %62 }
  0x21   :  { %v65_v7 = vpop.eup %64  ;;  %v31_v8 = vadd.f32 1.0, %v63_v6 }
  0x22   :  { %v32_v9 = vadd.f32 1.0, %v65_v7 }
  0x23   :  { %66 = vrcp.f32 %v31_v8 }
  0x24   :  { %68 = vrcp.f32 %v32_v9 }
  0x30   :  { %v67_v10 = vpop.eup %66 }
  0x31   :  { %v69_v11 = vpop.eup %68  ;;  %v37_v12 = vmul.f32 %v67_v10, %v23_v0 }
  0x32   :  { %v38_v13 = vmul.f32 %v69_v11, %v24_v1 }
  0x33   :  { %39 = vst [vmem:[#allocation5] sm:$0xff] %v37_v12 }
  0x34   :  { %40 = vst [vmem:[#allocation5 + $0x8] sm:$0xff] %v38_v13 }
  0x35   :  { %101 = shalt.err (!%p98_p9)
}
  0x36   :  { %52 = dma.vmem_to_hbm [thread:$0]  %s47_s14, 256, %s141_s1, [#allocation4], %s115_s9, %s115_s9, %s116_s10  }
  0x37   :  { %112 = dma.done.wait [#allocation4], 256  }
  0x38   :  { %113 = vsyncadd [#allocation4], 4294967040 }
  0x39   :  { %56 = vsyncpa [#allocation3], 1 }
  0x3a   :  { %57 = vsyncpa [#allocation4], 1 }

</bundles_post_ra>
